<compile_context>
chip_gen: v7x
topology: tpu7x:2x2x1
jax: 0.10.0
libtpu: 0.0.40
codegen_flags: <defaults>
</compile_context>

<pallas_src>
import numpy as np

import jax
import jax.numpy as jnp
from jax.experimental import pallas as pl
from jax.experimental.pallas import tpu as pltpu


def ple_kernel(x_ref, e_ref, lo_ref, hi_ref, w_ref, blin_ref, o_ref):
    # x_ref:   (TB, G+1)    batch tile of one feature group; last column is constant 1
    # e_ref:   (G+1, G*M)   per-group expansion matrix; row G holds the encoder bias
    # lo/hi:   (1, G*M)     per-column clamp bounds (+-inf where a side is unclamped)
    # w_ref:   (G*M, GDp)   per-group block-diagonal _NLinear weight (lane-padded)
    # blin:    (1, GDp)     per-group _NLinear bias (lane-padded)
    # o_ref:   (TB, GDp)    lane-dense output slab
    t = jnp.dot(x_ref[...], e_ref[...], preferred_element_type=jnp.float32)
    t = jnp.minimum(jnp.maximum(t, lo_ref[...]), hi_ref[...])
    y = jnp.dot(t.astype(w_ref.dtype), w_ref[...], preferred_element_type=jnp.float32)
    o_ref[...] = jnp.maximum(y + blin_ref[...], 0.0)


def prepare_ple_params(enc_w, enc_b, lin_w, lin_b, single_bin_mask=None, *,
                       mxu_k=128, lane=128, weights_dtype=jnp.float32):
    """Precompute (once, at module-init time) the grouped kernel operands.

    mxu_k:   target contraction depth per feature group (G*M ~= mxu_k);
             128 fills the v5e MXU, 256 fills v6e/v7x.
    weights_dtype: dtype of the second-matmul weights (bf16 for v6e/v7x peak rate).
    """
    f32 = jnp.float32
    F, M = enc_w.shape
    D = lin_w.shape[-1]

    G = max(1, min(F, max(1, mxu_k // M)))          # features per group
    n_groups = -(-F // G)
    Fp = n_groups * G
    GM, GD = G * M, G * D
    GD_pad = -(-GD // lane) * lane                  # lane-dense output width

    pf = Fp - F
    enc_w_p = jnp.pad(enc_w.astype(f32), ((0, pf), (0, 0)))
    enc_b_p = jnp.pad(enc_b.astype(f32), ((0, pf), (0, 0)))
    lin_w_p = jnp.pad(lin_w.astype(f32), ((0, pf), (0, 0), (0, 0)))
    lin_b_p = jnp.pad(lin_b.astype(f32), ((0, pf), (0, 0)))

    eye = jnp.eye(G, dtype=f32)

    # E[g, i, j*M+m] = enc_w[g*G+j, m] * (i==j);  E[g, G, j*M+m] = enc_b[g*G+j, m]
    ew = enc_w_p.reshape(n_groups, G, M)
    eb = enc_b_p.reshape(n_groups, G, M)
    E = (eye[None, :, :, None] * ew[:, None, :, :]).reshape(n_groups, G, GM)
    E = jnp.concatenate([E, eb.reshape(n_groups, 1, GM)], axis=1)      # (ng, G+1, GM)

    # W[g, j*M+m, i*D+d] = lin_w[g*G+j, m, d] * (i==j), lane-padded to GD_pad
    lw = lin_w_p.reshape(n_groups, G, M, D)
    W = (eye[None, :, None, :, None] * lw[:, :, :, None, :]).reshape(n_groups, GM, GD)
    W = jnp.pad(W, ((0, 0), (0, 0), (0, GD_pad - GD))).astype(weights_dtype)
    blin = jnp.pad(lin_b_p.reshape(n_groups, 1, GD),
                   ((0, 0), (0, 0), (0, GD_pad - GD)))

    # Per-column clamp bounds (mirrors the torch.cat of clamps in the PyTorch forward).
    if M > 1:
        hi_f = jnp.full((Fp, M), 1.0, f32).at[:, M - 1].set(jnp.inf)
        lo_f = jnp.zeros((Fp, M), f32).at[:, 0].set(-jnp.inf)
        if single_bin_mask is not None:
            sbm = jnp.pad(jnp.asarray(single_bin_mask, bool), (0, pf))
            lo_f = lo_f.at[:, M - 1].set(jnp.where(sbm, -jnp.inf, 0.0))
    else:
        hi_f = jnp.full((Fp, M), jnp.inf, f32)
        lo_f = jnp.full((Fp, M), -jnp.inf, f32)
    lo = lo_f.reshape(n_groups, 1, GM)
    hi = hi_f.reshape(n_groups, 1, GM)

    meta = dict(F=F, Fp=Fp, G=G, M=M, D=D, GD=GD, GD_pad=GD_pad, n_groups=n_groups)
    return dict(E=E, lo=lo, hi=hi, W=W, blin=blin, meta=meta)


def piecewise_linear_embeddings(x, params, *, block_b=256):
    """x: (B, F) f32 -> (B, F, D) f32, matching
    PiecewiseLinearEmbeddings(version='A', activation=True).forward."""
    meta = params["meta"]
    F, Fp, G, M, D = meta["F"], meta["Fp"], meta["G"], meta["M"], meta["D"]
    GD, GD_pad, n_groups = meta["GD"], meta["GD_pad"], meta["n_groups"]
    GM = G * M
    B = x.shape[0]
    assert x.shape == (B, F), x.shape

    # Sublane-aligned batch tile (enforced multiple of 8); pad batch to a whole grid.
    b_aligned = ((B + 7) // 8) * 8
    TB = max(8, (min(block_b, b_aligned) // 8) * 8)
    Bp = ((B + TB - 1) // TB) * TB

    # x -> (n_groups, Bp, G+1); trailing ones column folds the encoder bias into dot #1.
    xf = jnp.pad(x.astype(jnp.float32), ((0, Bp - B), (0, Fp - F)))
    xg = xf.reshape(Bp, n_groups, G)
    xg = jnp.pad(xg, ((0, 0), (0, 0), (0, 1)), constant_values=1.0)
    xg = jnp.transpose(xg, (1, 0, 2))

    E, lo, hi, W, blin = (params["E"], params["lo"], params["hi"],
                          params["W"], params["blin"])

    # VMEM budget from actual (double-buffered) block sizes; keeps v7x (64 MiB) safe
    # and raises v5e's 16 MiB default scoped limit.
    wsz = jnp.dtype(W.dtype).itemsize
    blk_bytes = (TB * (G + 1) * 4 + (G + 1) * GM * 4 + 2 * GM * 4
                 + GM * GD_pad * wsz + GD_pad * 4 + TB * GD_pad * 4)
    vmem_limit = int(min(64 << 20,
                         max(32 << 20, 2 * blk_bytes + 2 * TB * GM * 4 + (2 << 20))))

    out = pl.pallas_call(
        ple_kernel,
        out_shape=jax.ShapeDtypeStruct((Bp, n_groups * GD_pad), jnp.float32),
        grid_spec=pltpu.PrefetchScalarGridSpec(
            num_scalar_prefetch=0,
            # group axis OUTER (weights DMA'd once per group), batch tiles inner
            grid=(n_groups, Bp // TB),
            in_specs=[
                pl.BlockSpec((None, TB, G + 1), lambda g, i: (g, i, 0)),   # x tile
                pl.BlockSpec((None, G + 1, GM), lambda g, i: (g, 0, 0)),   # E (per group)
                pl.BlockSpec((None, 1, GM), lambda g, i: (g, 0, 0)),       # clamp lo
                pl.BlockSpec((None, 1, GM), lambda g, i: (g, 0, 0)),       # clamp hi
                pl.BlockSpec((None, GM, GD_pad), lambda g, i: (g, 0, 0)),  # group W
                pl.BlockSpec((None, 1, GD_pad), lambda g, i: (g, 0, 0)),   # group bias
            ],
            out_specs=pl.BlockSpec((TB, GD_pad), lambda g, i: (i, g)),     # lane-dense
        ),
        compiler_params=pltpu.CompilerParams(
            dimension_semantics=("parallel", "parallel"),
            vmem_limit_bytes=vmem_limit),
    )(xg, E, lo, hi, W, blin)

    # Strip batch padding, lane padding (GD_pad -> GD) and dummy features (Fp -> F).
    out = out[:B].reshape(B, n_groups, GD_pad)[:, :, :GD]
    return out.reshape(B, Fp, D)[:, :F]


def make_ple_params(bins):
    """Mirror _PiecewiseLinearEncodingImpl.__init__ -> (F, max_n_bins) weight/bias."""
    F = len(bins)
    n_bins = [len(e) - 1 for e in bins]
    M = max(n_bins)
    w = np.zeros((F, M), np.float32)
    b = np.zeros((F, M), np.float32)
    for i, edges in enumerate(bins):
        e = np.asarray(edges, np.float32)
        width = np.diff(e)
        wi = 1.0 / width
        bi = -e[:-1] / width
        w[i, -1] = wi[-1]
        b[i, -1] = bi[-1]
        w[i, : n_bins[i] - 1] = wi[:-1]
        b[i, : n_bins[i] - 1] = bi[:-1]
    return jnp.asarray(w), jnp.asarray(b)


def reference(x, enc_w, enc_b, lin_w, lin_b, single_bin_mask=None):
    """Pure-JAX mirror of the PyTorch forward pass (version='A', activation=True)."""
    t = enc_b[None] + enc_w[None] * x[..., None]            # (B, F, M)  torch.addcmul
    M = t.shape[-1]
    if M > 1:
        first = jnp.minimum(t[..., :1], 1.0)
        mid = jnp.clip(t[..., 1:-1], 0.0, 1.0)
        last = jnp.maximum(t[..., -1:], 0.0)
        if single_bin_mask is not None:
            last = jnp.where(single_bin_mask[:, None], t[..., -1:], last)
        t = jnp.concatenate([first, mid, last], axis=-1)
    y = jnp.einsum("bfm,fmd->bfd", t, lin_w,
                   precision=jax.lax.Precision.HIGHEST) + lin_b[None]
    return jax.nn.relu(y)


if __name__ == "__main__":
    # Small, module-consistent shapes.
    batch_size = 40
    d_embedding = 24
    n_edges_per_feature = [9, 6, 9]       # n_bins = [8, 5, 8] -> max_n_bins M = 8
    n_features = len(n_edges_per_feature)

    key = jax.random.PRNGKey(0)
    k_x, k_bins, k_w, k_b = jax.random.split(key, 4)

    # Deterministic, strictly sorted bin edges (jittered linspace keeps widths bounded).
    bins = []
    bin_keys = jax.random.split(k_bins, n_features)
    for kf, ne in zip(bin_keys, n_edges_per_feature):
        base = jnp.linspace(-2.5, 2.5, ne)
        spacing = 5.0 / (ne - 1)
        jit = 0.3 * spacing * jax.random.uniform(kf, (ne,), jnp.float32, -1.0, 1.0)
        bins.append((base + jit).astype(jnp.float32))

    enc_w, enc_b = make_ple_params(bins)                    # (F, M), (F, M)
    M = enc_w.shape[1]

    # _NLinear init: U(-d_in^-0.5, d_in^-0.5), d_in = max_n_bins.
    bound = M ** (-0.5)
    lin_w = jax.random.uniform(
        k_w, (n_features, M, d_embedding), jnp.float32, -bound, bound)
    lin_b = jax.random.uniform(
        k_b, (n_features, d_embedding), jnp.float32, -bound, bound)

    x = jax.random.normal(k_x, (batch_size, n_features), dtype=jnp.float32)

    # Precompute grouped operands once (init-time).  mxu_k=16 -> G=2 features/group,
    # 2 groups + 1 dummy padded feature; block_b=16 -> 3 batch tiles (40 -> 48 padded).
    # Exercises feature grouping, feature/batch/lane padding and the 2-D grid.
    params = prepare_ple_params(enc_w, enc_b, lin_w, lin_b, mxu_k=16)
    out = piecewise_linear_embeddings(x, params, block_b=16)
    out = jax.block_until_ready(out)

    ref = reference(x, enc_w, enc_b, lin_w, lin_b)

    assert out.shape == (batch_size, n_features, d_embedding), out.shape
    max_err = float(jnp.max(jnp.abs(out - ref)))
    assert jnp.allclose(out, ref, atol=1e-4, rtol=1e-4), max_err

    print("KERNEL_OK")
</pallas_src>

<mosaic_0001>
module attributes {stable_mosaic.version = 11 : i64} {
  func.func @ple_kernel(%arg0: i32, %arg1: i32, %arg2: memref<1x16x3xf32, #tpu.memory_space<vmem>>, %arg3: memref<1x3x16xf32, #tpu.memory_space<vmem>>, %arg4: memref<1x1x16xf32, #tpu.memory_space<vmem>>, %arg5: memref<1x1x16xf32, #tpu.memory_space<vmem>>, %arg6: memref<1x16x128xf32, #tpu.memory_space<vmem>>, %arg7: memref<1x1x128xf32, #tpu.memory_space<vmem>>, %arg8: memref<16x128xf32, #tpu.memory_space<vmem>>) attributes {dimension_semantics = [#tpu.dimension_semantics<parallel>, #tpu.dimension_semantics<parallel>], iteration_bounds = array<i64: 2, 3>, scalar_prefetch = 0 : i64, scratch_operands = 0 : i64, tpu.core_type = #tpu.core_type<tc>, window_params = [{transform_indices = @transform_0, window_bounds = array<i64: 1, 16, 3>}, {transform_indices = @transform_1, window_bounds = array<i64: 1, 3, 16>}, {transform_indices = @transform_2, window_bounds = array<i64: 1, 1, 16>}, {transform_indices = @transform_3, window_bounds = array<i64: 1, 1, 16>}, {transform_indices = @transform_4, window_bounds = array<i64: 1, 16, 128>}, {transform_indices = @transform_5, window_bounds = array<i64: 1, 1, 128>}, {transform_indices = @transform_6, window_bounds = array<i64: 16, 128>}]} {
    %c0 = arith.constant 0 : index
    %c0_0 = arith.constant 0 : index
    %c0_1 = arith.constant 0 : index
    %0 = vector.load %arg2[%c0, %c0_0, %c0_1] : memref<1x16x3xf32, #tpu.memory_space<vmem>>, vector<1x16x3xf32>
    %1 = vector.shape_cast %0 : vector<1x16x3xf32> to vector<16x3xf32>
    %c0_2 = arith.constant 0 : index
    %c0_3 = arith.constant 0 : index
    %c0_4 = arith.constant 0 : index
    %2 = vector.load %arg3[%c0_2, %c0_3, %c0_4] : memref<1x3x16xf32, #tpu.memory_space<vmem>>, vector<1x3x16xf32>
    %3 = vector.shape_cast %2 : vector<1x3x16xf32> to vector<3x16xf32>
    %cst = arith.constant dense<0.000000e+00> : vector<16x16xf32>
    %4 = tpu.matmul %1, %3, %cst {dimension_numbers = #tpu.dot_dimension_numbers<[1], [0], [0], [1], [0, 0, 1, 1], [], []>} : vector<16x3xf32>, vector<3x16xf32>, vector<16x16xf32> -> vector<16x16xf32>
    %c0_5 = arith.constant 0 : index
    %c0_6 = arith.constant 0 : index
    %c0_7 = arith.constant 0 : index
    %5 = vector.load %arg4[%c0_5, %c0_6, %c0_7] : memref<1x1x16xf32, #tpu.memory_space<vmem>>, vector<1x1x16xf32>
    %6 = vector.shape_cast %5 : vector<1x1x16xf32> to vector<1x16xf32>
    %7 = vector.broadcast %6 : vector<1x16xf32> to vector<16x16xf32>
    %8 = arith.maximumf %4, %7 : vector<16x16xf32>
    %c0_8 = arith.constant 0 : index
    %c0_9 = arith.constant 0 : index
    %c0_10 = arith.constant 0 : index
    %9 = vector.load %arg5[%c0_8, %c0_9, %c0_10] : memref<1x1x16xf32, #tpu.memory_space<vmem>>, vector<1x1x16xf32>
    %10 = vector.shape_cast %9 : vector<1x1x16xf32> to vector<1x16xf32>
    %11 = vector.broadcast %10 : vector<1x16xf32> to vector<16x16xf32>
    %12 = arith.minimumf %8, %11 : vector<16x16xf32>
    %c0_11 = arith.constant 0 : index
    %c0_12 = arith.constant 0 : index
    %c0_13 = arith.constant 0 : index
    %13 = vector.load %arg6[%c0_11, %c0_12, %c0_13] : memref<1x16x128xf32, #tpu.memory_space<vmem>>, vector<1x16x128xf32>
    %14 = vector.shape_cast %13 : vector<1x16x128xf32> to vector<16x128xf32>
    %cst_14 = arith.constant dense<0.000000e+00> : vector<16x128xf32>
    %15 = tpu.matmul %12, %14, %cst_14 {dimension_numbers = #tpu.dot_dimension_numbers<[1], [0], [0], [1], [0, 0, 1, 1], [], []>} : vector<16x16xf32>, vector<16x128xf32>, vector<16x128xf32> -> vector<16x128xf32>
    %c0_15 = arith.constant 0 : index
    %c0_16 = arith.constant 0 : index
    %c0_17 = arith.constant 0 : index
    %16 = vector.load %arg7[%c0_15, %c0_16, %c0_17] : memref<1x1x128xf32, #tpu.memory_space<vmem>>, vector<1x1x128xf32>
    %17 = vector.shape_cast %16 : vector<1x1x128xf32> to vector<1x128xf32>
    %18 = vector.broadcast %17 : vector<1x128xf32> to vector<16x128xf32>
    %19 = arith.addf %15, %18 : vector<16x128xf32>
    %cst_18 = arith.constant 0.000000e+00 : f32
    %20 = vector.broadcast %cst_18 : f32 to vector<16x128xf32>
    %21 = arith.maximumf %19, %20 : vector<16x128xf32>
    %c0_19 = arith.constant 0 : index
    %c0_20 = arith.constant 0 : index
    %22 = vector.load %arg8[%c0_19, %c0_20] : memref<16x128xf32, #tpu.memory_space<vmem>>, vector<16x128xf32>
    tpu.vector_store %arg8[%c0_19, %c0_20], %21 {strides = array<i32>} : memref<16x128xf32, #tpu.memory_space<vmem>>, vector<16x128xf32>,
    return
  }
  func.func @transform_0(%arg0: i32, %arg1: i32) -> (i32, i32, i32) {
    %c0_i32 = arith.constant 0 : i32
    %c0_i32_0 = arith.constant 0 : i32
    return %arg0, %arg1, %c0_i32 : i32, i32, i32
  }
  func.func @transform_1(%arg0: i32, %arg1: i32) -> (i32, i32, i32) {
    %c0_i32 = arith.constant 0 : i32
    %c0_i32_0 = arith.constant 0 : i32
    %c0_i32_1 = arith.constant 0 : i32
    return %arg0, %c0_i32, %c0_i32_0 : i32, i32, i32
  }
  func.func @transform_2(%arg0: i32, %arg1: i32) -> (i32, i32, i32) {
    %c0_i32 = arith.constant 0 : i32
    %c0_i32_0 = arith.constant 0 : i32
    %c0_i32_1 = arith.constant 0 : i32
    return %arg0, %c0_i32, %c0_i32_0 : i32, i32, i32
  }
  func.func @transform_3(%arg0: i32, %arg1: i32) -> (i32, i32, i32) {
    %c0_i32 = arith.constant 0 : i32
    %c0_i32_0 = arith.constant 0 : i32
    %c0_i32_1 = arith.constant 0 : i32
    return %arg0, %c0_i32, %c0_i32_0 : i32, i32, i32
  }
  func.func @transform_4(%arg0: i32, %arg1: i32) -> (i32, i32, i32) {
    %c0_i32 = arith.constant 0 : i32
    %c0_i32_0 = arith.constant 0 : i32
    %c0_i32_1 = arith.constant 0 : i32
    return %arg0, %c0_i32, %c0_i32_0 : i32, i32, i32
  }
  func.func @transform_5(%arg0: i32, %arg1: i32) -> (i32, i32, i32) {
    %c0_i32 = arith.constant 0 : i32
    %c0_i32_0 = arith.constant 0 : i32
    %c0_i32_1 = arith.constant 0 : i32
    return %arg0, %c0_i32, %c0_i32_0 : i32, i32, i32
  }
  func.func @transform_6(%arg0: i32, %arg1: i32) -> (i32, i32) {
    %c0_i32 = arith.constant 0 : i32
    return %arg1, %arg0 : i32, i32
  }
}

</mosaic_0001>

<bundles_post_ra>
// kernel: tpu_custom_call.1
= control target key start
LH: loop header
LB: loop body
LE: loop exit
PB: predicated region body
PF: predicated region fallthrough
CT: control target
= control target key end

     0   :  { %11 = vsyncpa [#allocation3], 0  ;;  %s1132_s0 = inlined_call_operand.vmem [shape: f32[2,48,3], index: 0, kind: input, shape index: {}]   ;;  %s1133_s1 = inlined_call_operand.vmem [shape: f32[2,3,16], index: 1, kind: input, shape index: {}]   ;;  %s1134_s2 = inlined_call_operand.vmem [shape: f32[2,1,16], index: 2, kind: input, shape index: {}]   ;;  %s1135_s3 = inlined_call_operand.vmem [shape: f32[2,1,16], index: 3, kind: input, shape index: {}]   ;;  %s1136_s4 = inlined_call_operand.vmem [shape: f32[2,16,128], index: 4, kind: input, shape index: {}]   ;;  %s1137_s5 = inlined_call_operand.vmem [shape: f32[2,1,128], index: 5, kind: input, shape index: {}]   ;;  %s1138_s6 = inlined_call_operand.hbm [shape: f32[48,256], index: 6, kind: output, shape index: {}]  }
   0x1   :  { %13 = vsyncpa [#allocation3 + $0x1], 0  ;;  %s970_s21 = smov 0   ;;  %s972_s22 = smov 0  }
   0x2   :  { %s974_s23 = smov 0   ;;  %s976_s24 = smov 0  }
   0x3   :  { %s978_s25 = smov 0   ;;  %s980_s26 = smov 0  }
   0x4   :  { %s982_s27 = smov 0   ;;  %s984_s28 = smov 0  }
   0x5 LB: > { %1142 = sst [smem:[#allocation5_spill]] %s925_s27  ;;  %s710_s29 = sadd.s32 4294967295, %s929_s28   ;;  %s929_s28 = sphi %s984_s28, %s19_s28   ;;  %s925_s27 = sphi %s982_s27, %s1149_s27   ;;  %s921_s26 = sphi %s980_s26, %s1154_s26   ;;  %s917_s25 = sphi %s978_s25, %s1147_s25   ;;  %s913_s24 = sphi %s976_s24, %s1153_s24   ;;  %s909_s23 = sphi %s974_s23, %s1152_s23   ;;  %s905_s22 = sphi %s972_s22, %s1151_s22   ;;  %s901_s21 = sphi %s970_s21, %s1150_s21  }
   0x6   : > { %s711_s30 = sadd.s32 4294967294, %s929_s28   ;;  %s28_s7 = sadd.s32 1, %s921_s26 }
   0x7   : > { %p29_p0 = scmp.ge.s32.totalorder %s28_s7, 3  ;;  %s31_s8 = sadd.s32 1, %s925_s27 }
   0x8   : > { %p208_p1 = scmp.ne.s32.totalorder %s909_s23, %s905_s22  ;;  %p209_p2 = scmp.eq.s32.totalorder %s710_s29, 5 }
   0x9   : > { %s1156_s7 = smov (%p29_p0, %s28_s7), 0  ;;  %s1158_s8 = smov (!%p29_p0, %s31_s8), %s925_s27 }
   0xa   : > { %1143 = sst [smem:[#allocation6_spill]] %s1156_s7  ;;  %s193_s9 = ssub.s32 %s921_s26, %s1156_s7 }
   0xb   : > { %p1021_p3 = por %p209_p2, %p208_p1  ;;  %p33_p4 = scmp.ge.s32.totalorder %s1158_s8, 2 }
   0xc   : > { %p214_p5 = scmp.ne.s32.totalorder %s905_s22, %s901_s21  ;;  %p215_p6 = scmp.eq.s32.totalorder %s711_s30, 5 }
   0xd   : > { %p714_p7 = scmp.ge.s32.totalorder %s929_s28, 1  ;;  %s1160_s8 = smov (%p33_p4, %s1158_s8), 0 }
   0xe   : > { %1145 = sst [smem:[#allocation7_spill]] %s1160_s8  ;;  %p1030_p8 = por %p215_p6, %p214_p5 }
   0xf   : > { %p279_p9 = scmp.lt.s32.totalorder %s929_s28, 7  ;;  %s194_s12 = ssub.s32 %s925_s27, %s1160_s8 }
  0x10   : > { %s198_s13 = sadd.s32 1, %s909_s23  ;;  %s195_s14 = sor.u32 %s194_s12, %s193_s9 }
  0x11   : > { %p280_p10 = pnand %p714_p7, %p279_p9  ;;  %p196_p11 = scmp.eq.s32.totalorder %s195_s14, 0 }
  0x12   : > { %p332_p12 = scmp.lt.s32.totalorder (!%p280_p10), %s917_s25, 1  ;;  %s716_s16 = sshll.u32 (!%p280_p10), %s913_s24, 1  ;;  %vm370_vm0 = vcmask (!%p280_p10), 1042432   ;;  %vm363_vm1 = vcmask (!%p280_p10), 23552   ;;  %vm476_vm2 = vcmask (!%p280_p10), 130048  }
  0x13   : > { %s1039_s15 = scalar_select %p196_p11, %s909_s23, %s198_s13  }
  0x14   : > { %283 = sbr.rel (%p280_p10) target bundleno = 487 (0x1e7), region = 44  ;;  %p334_p13 = scmp.lt.s32.totalorder (!%p280_p10), %s716_s16, 5 }
  0x15   : > { %s328_s27 = sand.u32 (!%p280_p10), 1, %s905_s22  }
  0x1b   : > { %s1044_s17 = scalar_select %p332_p12, %s917_s25, 1 }
  0x1c   : > { %s1162_s16 = smov (!%p334_p13, %s716_s16), 5 }
  0x1d   : > { %s718_s18 = sshll.u32 %s1044_s17, 2  ;;  %s760_s19 = smul.u32 6, %s1044_s17 }
  0x1e   : > { %s344_s30 = scalar_lea.vmem %s1133_s1, %s718_s18  ;;  %s735_s7 = sshll.u32 %s1044_s17, 4 }
  0x1f   : > { %v362_v0 = vld [vmem:[%s344_s30] sm:$0x7]  ;;  %s337_s9 = sadd.s32 %s760_s19, %s1162_s16  ;;  %s355_s18 = scalar_lea.vmem %s1136_s4, %s735_s7 }
  0x20   : > { %744 = vmatprep.subr.msk.mxu0 %vm370_vm0, %v362_v0  ;;  %s717_s12 = sshll.u32 %s337_s9, 3  ;;  %v467_v3 = vld [vmem:[%s355_s18] sm:$0xff]  ;;  %v468_v4 = vld [vmem:[%s355_s18 + $0x8] sm:$0xff]  ;;  %s347_s29 = scalar_lea.vmem %s1134_s2, %s1044_s17 }
  0x21   : > { %745 = vmatpush3.msk.msra.mxu0 %vm370_vm0, %v362_v0  ;;  %s339_s8 = scalar_lea.vmem %s1132_s0, %s717_s12  ;;  %v756_v5 = vpack.c.bf16 %v468_v4, %v467_v3  ;;  %s350_s9 = scalar_lea.vmem %s1135_s3, %s1044_s17  ;;  %v724_v6 = vld [vmem:[%s347_s29] ss:$0 sm:$0xff] }
  0x22   : > { %v360_v1 = vld [vmem:[%s339_s8] sm:$0xff]  ;;  %v361_v2 = vld [vmem:[%s339_s8 + $0x8] sm:$0xff]  ;;  %s715_s7 = sshll.u32 %s328_s27, 4  ;;  %s736_s12 = sshll.u32 %s913_s24, 2 }
  0x23   : > { %746 = vmatprep.mubr.msk.f32.mxu0 %vm363_vm1, %v360_v1  ;;  %757 = vmatprep.subr.bf16.mxu1 %v756_v5  ;;  %v725_v9 = vld [vmem:[%s350_s9] ss:$0 sm:$0xff]  ;;  %s358_s20 = scalar_lea.vmem %s1137_s5, %s1044_s17  ;;  %s575_s18 = sadd.s32 %s917_s25, %s736_s12 }
  0x24   : > { %747 = vmatmul.mubr.msk.f32.vlgmr.msra.gmra.mrb[0].mxu0 %vm363_vm1, %v361_v2  ;;  %759 = vmatpush3.bf16.msra.mxu1 %v756_v5  ;;  %v726_v14 = vld [vmem:[%s358_s20] ss:$0 sm:$0xff]  ;;  %s330_s16 = scalar_lea.vmem [#allocation2], %s715_s7  ;;  %s732_s29 = sshll.u32 %s575_s18, 7 }
  0x25   : > { %s578_s19 = sshll.u32 %s330_s16, 4  ;;  %s1078_s17 = scalar_lea.hbm %s1138_s6, %s732_s29  ;;  %s1073_s19 = int_to_ptr.vmem [resolvable:$true] %s578_s19 }
  0x26   : > { %s1080_s25 = scalar_lea.sflag [#allocation3], %s328_s27  ;;  %s835_s8 = scalar_lea.vmem %s1073_s19, 256 }
  0x27   : > { %p836_p0 = scmp.ne.s32.totalorder %s1073_s19, %s835_s8  ;;  %s931_s9 = smov [#allocation2]  }
  0x28   : > { %s839_s7 = sshll.u32 %s931_s9, 4  ;;  %s840_s7 = int_to_ptr.vmem [resolvable:$false] %s839_s7 }
  0x29   : > { %p837_p1 = pnand %p836_p0, %p1021_p3  ;;  %s841_s12 = scalar_lea.vmem %s840_s7, 512 }
  0x2a   : > { %p842_p4 = scmp.lt.s32.totalorder %s1073_s19, %s840_s7  ;;  %p843_p5 = scmp.lt.s32.totalorder %s841_s12, %s835_s8 }
  0x2b   : > { %p838_p2 = pneg %p837_p1 }
  0x2c   : > { %p844_p6 = por %p843_p5, %p842_p4 }
  0x2e   : > { %p845_p7 = pnand %p844_p6, %p838_p2 }
  0xf7   : > { %v748_v7 = vpop.f32.mrb[0].mxu0 }
  0xf8   : > { %v457_v8 = vmax.f32 %v748_v7, %v724_v6  ;;  %v440_v10 = vpop.f32.mrb[1].mxu0 }
  0xf9   : > { %v456_v11 = vmax.f32 %v440_v10, %v724_v6 }
  0xfa   : > { %v466_v13 = vmin.f32 %v457_v8, %v725_v9 }
  0xfb   : > { %v465_v12 = vmin.f32 %v456_v11, %v725_v9 }
  0xfd   : > { %753 = vmatprep.mubr.msk.f32.mxu1 %vm476_vm2, %v465_v12 }
  0xfe   : > { %754 = vmatmul.mubr.msk.f32.vlgmr.msra.gmra.mrb[0].mxu1 %vm476_vm2, %v466_v13 }
 0x1d1   : > { %v755_v15 = vpop.f32.mrb[0].mxu1 }
 0x1d2   : > { %v555_v16 = vadd.f32 %v755_v15, %v726_v14  ;;  %v549_v17 = vpop.f32.mrb[1].mxu1 }
 0x1d3   : > { %v550_v18 = vadd.f32 %v726_v14, %v549_v17 }
 0x1d4   : > { %v559_v19 = vmax.f32 %v555_v16, 0.0 }
 0x1d5   : > { %v558_v20 = vmax.f32 %v550_v18, 0.0 }
 0x1d6   : > { %561 = vst [vmem:[%s330_s16 + $0x8] sm:$0xff] %v559_v19 }
 0x1d7   : > { %560 = vst [vmem:[%s330_s16] sm:$0xff] %v558_v20 }
 0x1d8   : > { %848 = shalt.err (!%p845_p7)
}
 0x1d9   : > { %s849_s27 = scalar_lea.hbm %s1078_s17, 256  ;;  %s853_s20 = scalar_lea.hbm %s1138_s6, 1536 }
 0x1da   : > { %p850_p9 = scmp.ne.s32.totalorder %s1078_s17, %s849_s27  ;;  %p854_p12 = scmp.lt.u32.totalorder %s1078_s17, %s1138_s6 }
 0x1db   : > { %p855_p13 = scmp.lt.u32.totalorder %s853_s20, %s849_s27  ;;  %p857_p1 = scmp.lt.u32.totalorder %s849_s27, %s1078_s17 }
 0x1dc   : > { %p851_p10 = pnand %p850_p9, %p1021_p3 }
 0x1dd   : > { %p856_p0 = por %p855_p13, %p854_p12 }
 0x1de   : > { %p852_p11 = pneg %p851_p10 }
 0x1df   : > { %p858_p2 = por %p857_p1, %p856_p0 }
 0x1e1   : > { %p859_p4 = pnand %p858_p2, %p852_p11 }
 0x1e3   : > { %862 = shalt.err (!%p859_p4)
}
 0x1e4   : > { %s932_s29 = smov 128   ;;  %s933_s24 = smov 256  }
 0x1e5   : > { %s934_s30 = smov 8  }
 0x1e6   : > { %761 = dma.vmem_to_hbm [thread:$0]  (%p1021_p3), %s1073_s19, 256, %s1078_s17, %s1080_s25, %s932_s29, %s933_s24, %s934_s30  }
 0x1e7 PF: > { %p767_p5 = scmp.ge.s32.totalorder %s929_s28, 2  ;;  %s593_s8 = sand.u32 1, %s901_s21  }
 0x1e8   : > { %s594_s9 = scalar_lea.sflag [#allocation3], %s593_s8 }
 0x1e9   : > { %p764_p6 = pnand %p767_p5, %p1030_p8 }
 0x1eb   : > { %896 = dma.done.wait (!%p764_p6), %s594_s9, 256  }
 0x1ec   : > { %898 = vsyncadd (!%p764_p6), %s594_s9, 4294967040  ;;  %s19_s28 = sadd.s32 1, %s929_s28   ;;  %s1147_s25 = sld [smem:[#allocation5_spill]] }
 0x1ed   : > { %p16_p7 = scmp.ge.s32.totalorder %s19_s28, 8   ;;  %s1148_s10 = sld [smem:[#allocation6_spill]] }
 0x1ee   : > { %s1149_s27 = sld [smem:[#allocation7_spill]]  ;;  %s1150_s21 = smov %s905_s22 }
 0x1ef   : > { %s1151_s22 = smov %s909_s23  ;;  %s1152_s23 = smov %s1039_s15 }
 0x1f0   : > { %s1153_s24 = smov %s921_s26  ;;  %18 = sbr.rel (!%p16_p7) target bundleno = 5 (0x5), region = 94 }
 0x1f3   : > { %s1154_s26 = smov %s1148_s10 }
 0x1f7   :  { %599 = vsyncpa [#allocation3], 1 }
 0x1f8   :  { %601 = vsyncpa [#allocation3 + $0x1], 1 }

</bundles_post_ra>
